<compile_context>
chip_gen: v7x
topology: tpu7x:2x2x1
jax: 0.10.0
libtpu: 0.0.40
codegen_flags: <defaults>
</compile_context>

<pallas_src>
import jax
import jax.numpy as jnp
from jax.experimental import pallas as pl
from jax.experimental.pallas import tpu as pltpu

FEAT_PAD = 128  # lane-dense padded feature width (vreg lane count)


def _gcn_fused_kernel(a_ref, x_ref, w_ref, gb_ref, alpha_ref, o_ref):
    """Single grid step. Layers unrolled statically; everything resident.

    a_ref:     [N, N]            bf16   normalized adjacency
    x_ref:     [N, 128]          bf16   padded node features
    w_ref:     [L, 128, 128]     bf16   padded GCNConv weights
    gb_ref:    [L, 8, 128]       f32    row 0 = gamma, row 1 = beta (padded)
    alpha_ref: [L]               f32    PReLU slopes (SMEM)
    o_ref:     [N, 128]          f32    padded output
    """
    num_layers = w_ref.shape[0]
    n = a_ref.shape[0]
    inv_n = 1.0 / n

    a = a_ref[...]        # [N, N] bf16, loaded once
    h = x_ref[...]        # [N, 128] bf16 layer input

    out = None
    for l in range(num_layers):  # static unroll; L is tiny
        # GCNConv: A_norm @ (H @ W)   (bf16 MXU inputs, f32 accumulation).
        # The conv bias is omitted: train-mode BN subtracts the per-feature
        # mean, which cancels any per-feature constant exactly.
        xw = jnp.dot(h, w_ref[l], preferred_element_type=jnp.float32)
        z = jnp.dot(a, xw.astype(jnp.bfloat16),
                    preferred_element_type=jnp.float32)

        # BatchNorm1d over nodes, training semantics (biased var, eps=1e-5),
        # two-pass mean/var with folded affine.
        mean = jnp.sum(z, axis=0, keepdims=True) * inv_n
        c = z - mean
        var = jnp.sum(c * c, axis=0, keepdims=True) * inv_n
        gb = gb_ref[l]                                  # [8, 128]
        s = gb[0:1, :] * jax.lax.rsqrt(var + 1e-5)      # gamma * rsqrt(var+eps)
        hn = c * s + gb[1:2, :]                         # (h-mean)*s + beta

        # PReLU with one learnable slope per layer (scalar read from SMEM).
        alpha = alpha_ref[l]
        out = jnp.where(hn > 0, hn, alpha * hn)

        h = out.astype(jnp.bfloat16)  # bf16 handoff to the next layer

    o_ref[...] = out


@jax.jit
def _gcn_forward_padded(a_bf16, x_pad, w_s, gb_s, al_s):
    n = x_pad.shape[0]
    num_layers = w_s.shape[0]

    grid_spec = pltpu.PrefetchScalarGridSpec(
        num_scalar_prefetch=0,
        grid=(1,),  # single step: everything resident, layers unrolled in-kernel
        in_specs=[
            pl.BlockSpec((n, n), lambda i: (0, 0)),                       # A_norm
            pl.BlockSpec((n, FEAT_PAD), lambda i: (0, 0)),                # X
            pl.BlockSpec((num_layers, FEAT_PAD, FEAT_PAD),
                         lambda i: (0, 0, 0)),                            # W stack
            pl.BlockSpec((num_layers, 8, FEAT_PAD), lambda i: (0, 0, 0)),  # gamma/beta
            pl.BlockSpec(memory_space=pltpu.MemorySpace.SMEM),            # alphas
        ],
        out_specs=pl.BlockSpec((n, FEAT_PAD), lambda i: (0, 0)),
    )

    flops = num_layers * (2 * n * FEAT_PAD * FEAT_PAD + 2 * n * n * FEAT_PAD)
    bytes_accessed = (a_bf16.size * 2 + x_pad.size * 2 + w_s.size * 2
                      + gb_s.size * 4 + al_s.size * 4 + n * FEAT_PAD * 4)

    return pl.pallas_call(
        _gcn_fused_kernel,
        out_shape=jax.ShapeDtypeStruct((n, FEAT_PAD), jnp.float32),
        grid_spec=grid_spec,
        cost_estimate=pl.CostEstimate(
            flops=int(flops),
            transcendentals=int(num_layers * FEAT_PAD),
            bytes_accessed=int(bytes_accessed)),
        compiler_params=pltpu.CompilerParams(
            dimension_semantics=("arbitrary",)),
    )(a_bf16, x_pad, w_s, gb_s, al_s)


def pack_params(params):
    """Stack + zero-pad per-layer params to the lane-dense width FEAT_PAD.

    Returns (W[L,128,128] bf16, gamma/beta slab [L,8,128] f32, alpha [L] f32).
    The GCNConv bias is intentionally not packed: a per-feature constant is
    cancelled exactly by the train-mode BatchNorm mean subtraction.
    """
    num_layers = len(params)
    ws = jnp.zeros((num_layers, FEAT_PAD, FEAT_PAD), jnp.float32)
    gb = jnp.zeros((num_layers, 8, FEAT_PAD), jnp.float32)
    al = jnp.zeros((num_layers,), jnp.float32)
    for l, (w, b, gamma, beta, alpha) in enumerate(params):
        din, dout = w.shape
        assert din <= FEAT_PAD and dout <= FEAT_PAD, "feature dims > 128 need K tiling"
        ws = ws.at[l, :din, :dout].set(w)
        gb = gb.at[l, 0, :dout].set(gamma)
        gb = gb.at[l, 1, :dout].set(beta)
        al = al.at[l].set(alpha)
    return ws.astype(jnp.bfloat16), gb, al


def gcn_forward(x, a_norm, params):
    n, d_in = x.shape
    # Node dim is used unpadded (full-array block); BN reduces over real rows only.
    assert n % 8 == 0, "node count must be a multiple of 8 (sublane) for this toy path"
    d_out = params[-1][0].shape[1]
    x_pad = jnp.zeros((n, FEAT_PAD), jnp.bfloat16).at[:, :d_in].set(
        x.astype(jnp.bfloat16))
    w_s, gb_s, al_s = pack_params(params)
    a_bf16 = a_norm.astype(jnp.bfloat16)  # halves traffic/residency of the O(N^2) operand
    out_pad = _gcn_forward_padded(a_bf16, x_pad, w_s, gb_s, al_s)
    return out_pad[:, :d_out]


def build_norm_adj(edge_index, num_nodes):
    """Dense D^{-1/2} (A + I_missing) D^{-1/2}, torch_geometric gcn_norm style:
    duplicate edges are summed, self-loops only added where missing."""
    src, dst = edge_index
    a = jnp.zeros((num_nodes, num_nodes), jnp.float32)
    a = a.at[dst, src].add(1.0)                       # scatter-add (dst aggregates src)
    diag = jnp.diagonal(a)
    idx = jnp.arange(num_nodes)
    a = a.at[idx, idx].set(jnp.where(diag > 0, diag, 1.0))  # add_remaining_self_loops
    deg = jnp.sum(a, axis=1)
    dinv = jnp.where(deg > 0, jax.lax.rsqrt(deg), 0.0)
    return dinv[:, None] * a * dinv[None, :]


def init_gcn_params(key, layer_sizes):
    """GCNConv(glorot W, zero b), BatchNorm(gamma=1, beta=0), PReLU(a=0.25)."""
    params = []
    for in_dim, out_dim in zip(layer_sizes[:-1], layer_sizes[1:]):
        key, wk = jax.random.split(key)
        limit = jnp.sqrt(6.0 / (in_dim + out_dim))
        w = jax.random.uniform(wk, (in_dim, out_dim), jnp.float32, -limit, limit)
        params.append((w,
                       jnp.zeros((out_dim,), jnp.float32),
                       jnp.ones((out_dim,), jnp.float32),
                       jnp.zeros((out_dim,), jnp.float32),
                       jnp.array(0.25, jnp.float32)))
    return params


def gcn_reference(x, a_norm, params):
    """Pure-JAX f32 reference (PyTorch forward semantics, train-mode BN)."""
    h = x
    for (w, b, gamma, beta, alpha) in params:
        h = a_norm @ (h @ w) + b
        mean = h.mean(0, keepdims=True)
        var = ((h - mean) ** 2).mean(0, keepdims=True)
        h = (h - mean) * jax.lax.rsqrt(var + 1e-5) * gamma + beta
        h = jnp.where(h > 0, h, alpha * h)
    return h


if __name__ == "__main__":
    key = jax.random.PRNGKey(0)

    num_nodes = 64
    layer_sizes = [16, 32, 32]

    key, xk = jax.random.split(key)
    x = jax.random.normal(xk, (num_nodes, layer_sizes[0]), jnp.float32)

    # Deterministic bidirectional ring graph as edge_index [2, E].
    idx = jnp.arange(num_nodes)
    src = jnp.concatenate([idx, (idx + 1) % num_nodes])
    dst = jnp.concatenate([(idx + 1) % num_nodes, idx])
    edge_index = jnp.stack([src, dst], axis=0)

    a_norm = build_norm_adj(edge_index, num_nodes)
    params = init_gcn_params(key, layer_sizes)

    out = gcn_forward(x, a_norm, params)
    jax.block_until_ready(out)

    ref = gcn_reference(x, a_norm, params)
    assert out.shape == (num_nodes, layer_sizes[-1])
    assert out.dtype == jnp.float32
    max_err = float(jnp.max(jnp.abs(out - ref)))
    assert jnp.allclose(out, ref, atol=5e-2, rtol=5e-2), f"max abs err {max_err}"
    print("KERNEL_OK")
</pallas_src>

<mosaic_0001>
module attributes {stable_mosaic.version = 11 : i64} {
  func.func @_gcn_fused_kernel(%arg0: i32, %arg1: memref<64x64xbf16, #tpu.memory_space<vmem>>, %arg2: memref<64x128xbf16, #tpu.memory_space<vmem>>, %arg3: memref<2x128x128xbf16, #tpu.memory_space<vmem>>, %arg4: memref<2x8x128xf32, #tpu.memory_space<vmem>>, %arg5: memref<2xf32, #tpu.memory_space<smem>>, %arg6: memref<64x128xf32, #tpu.memory_space<vmem>>) attributes {dimension_semantics = [#tpu.dimension_semantics<arbitrary>], iteration_bounds = array<i64: 1>, scalar_prefetch = 0 : i64, scratch_operands = 0 : i64, tpu.core_type = #tpu.core_type<tc>, window_params = [{pipeline_mode = #tpu.pipeline_mode<synchronous>, transform_indices = @transform_0, window_bounds = array<i64: 64, 64>}, {pipeline_mode = #tpu.pipeline_mode<synchronous>, transform_indices = @transform_1, window_bounds = array<i64: 64, 128>}, {pipeline_mode = #tpu.pipeline_mode<synchronous>, transform_indices = @transform_2, window_bounds = array<i64: 2, 128, 128>}, {pipeline_mode = #tpu.pipeline_mode<synchronous>, transform_indices = @transform_3, window_bounds = array<i64: 2, 8, 128>}, {transform_indices = @transform_4, window_bounds = array<i64: 2>}, {pipeline_mode = #tpu.pipeline_mode<synchronous>, transform_indices = @transform_5, window_bounds = array<i64: 64, 128>}]} {
    %c0 = arith.constant 0 : index
    %c0_0 = arith.constant 0 : index
    %0 = vector.load %arg1[%c0, %c0_0] : memref<64x64xbf16, #tpu.memory_space<vmem>>, vector<64x64xbf16>
    %c0_1 = arith.constant 0 : index
    %c0_2 = arith.constant 0 : index
    %1 = vector.load %arg2[%c0_1, %c0_2] : memref<64x128xbf16, #tpu.memory_space<vmem>>, vector<64x128xbf16>
    %c0_3 = arith.constant 0 : index
    %c0_4 = arith.constant 0 : index
    %c0_5 = arith.constant 0 : index
    %2 = vector.load %arg3[%c0_3, %c0_4, %c0_5] : memref<2x128x128xbf16, #tpu.memory_space<vmem>>, vector<1x128x128xbf16>
    %3 = vector.shape_cast %2 : vector<1x128x128xbf16> to vector<128x128xbf16>
    %cst = arith.constant dense<0.000000e+00> : vector<64x128xf32>
    %4 = tpu.matmul %1, %3, %cst {dimension_numbers = #tpu.dot_dimension_numbers<[1], [0], [0], [1], [0, 0, 1, 1], [], []>} : vector<64x128xbf16>, vector<128x128xbf16>, vector<64x128xf32> -> vector<64x128xf32>
    %5 = arith.truncf %4 : vector<64x128xf32> to vector<64x128xbf16>
    %cst_6 = arith.constant dense<0.000000e+00> : vector<64x128xf32>
    %6 = tpu.matmul %0, %5, %cst_6 {dimension_numbers = #tpu.dot_dimension_numbers<[1], [0], [0], [1], [0, 0, 1, 1], [], []>} : vector<64x64xbf16>, vector<64x128xbf16>, vector<64x128xf32> -> vector<64x128xf32>
    %cst_7 = arith.constant dense<0.000000e+00> : vector<128xf32>
    %7 = vector.multi_reduction <add>, %6, %cst_7 [0] : vector<64x128xf32> to vector<128xf32>
    %8 = vector.shape_cast %7 : vector<128xf32> to vector<1x128xf32>
    %cst_8 = arith.constant 1.562500e-02 : f32
    %9 = vector.broadcast %cst_8 : f32 to vector<1x128xf32>
    %10 = arith.mulf %8, %9 : vector<1x128xf32>
    %11 = vector.broadcast %10 : vector<1x128xf32> to vector<64x128xf32>
    %12 = arith.subf %6, %11 : vector<64x128xf32>
    %13 = arith.mulf %12, %12 : vector<64x128xf32>
    %cst_9 = arith.constant dense<0.000000e+00> : vector<128xf32>
    %14 = vector.multi_reduction <add>, %13, %cst_9 [0] : vector<64x128xf32> to vector<128xf32>
    %15 = vector.shape_cast %14 : vector<128xf32> to vector<1x128xf32>
    %cst_10 = arith.constant 1.562500e-02 : f32
    %16 = vector.broadcast %cst_10 : f32 to vector<1x128xf32>
    %17 = arith.mulf %15, %16 : vector<1x128xf32>
    %c0_11 = arith.constant 0 : index
    %c0_12 = arith.constant 0 : index
    %c0_13 = arith.constant 0 : index
    %18 = vector.load %arg4[%c0_11, %c0_12, %c0_13] : memref<2x8x128xf32, #tpu.memory_space<vmem>>, vector<1x8x128xf32>
    %19 = vector.shape_cast %18 : vector<1x8x128xf32> to vector<8x128xf32>
    %20 = vector.extract_strided_slice %19 {offsets = [0, 0], sizes = [1, 128], strides = [1, 1]} : vector<8x128xf32> to vector<1x128xf32>
    %cst_14 = arith.constant 9.99999974E-6 : f32
    %21 = vector.broadcast %cst_14 : f32 to vector<1x128xf32>
    %22 = arith.addf %17, %21 : vector<1x128xf32>
    %23 = math.rsqrt %22 : vector<1x128xf32>
    %24 = arith.mulf %20, %23 : vector<1x128xf32>
    %25 = vector.broadcast %24 : vector<1x128xf32> to vector<64x128xf32>
    %26 = arith.mulf %12, %25 : vector<64x128xf32>
    %27 = vector.extract_strided_slice %19 {offsets = [1, 0], sizes = [1, 128], strides = [1, 1]} : vector<8x128xf32> to vector<1x128xf32>
    %28 = vector.broadcast %27 : vector<1x128xf32> to vector<64x128xf32>
    %29 = arith.addf %26, %28 : vector<64x128xf32>
    %c0_15 = arith.constant 0 : index
    %30 = memref.load %arg5[%c0_15] : memref<2xf32, #tpu.memory_space<smem>>
    %cst_16 = arith.constant 0.000000e+00 : f32
    %31 = vector.broadcast %cst_16 : f32 to vector<64x128xf32>
    %32 = arith.cmpf ogt, %29, %31 : vector<64x128xf32>
    %33 = vector.broadcast %30 : f32 to vector<64x128xf32>
    %34 = arith.mulf %33, %29 : vector<64x128xf32>
    %35 = arith.select %32, %29, %34 : vector<64x128xi1>, vector<64x128xf32>
    %36 = arith.truncf %35 : vector<64x128xf32> to vector<64x128xbf16>
    %c1 = arith.constant 1 : index
    %c0_17 = arith.constant 0 : index
    %c0_18 = arith.constant 0 : index
    %37 = vector.load %arg3[%c1, %c0_17, %c0_18] : memref<2x128x128xbf16, #tpu.memory_space<vmem>>, vector<1x128x128xbf16>
    %38 = vector.shape_cast %37 : vector<1x128x128xbf16> to vector<128x128xbf16>
    %cst_19 = arith.constant dense<0.000000e+00> : vector<64x128xf32>
    %39 = tpu.matmul %36, %38, %cst_19 {dimension_numbers = #tpu.dot_dimension_numbers<[1], [0], [0], [1], [0, 0, 1, 1], [], []>} : vector<64x128xbf16>, vector<128x128xbf16>, vector<64x128xf32> -> vector<64x128xf32>
    %40 = arith.truncf %39 : vector<64x128xf32> to vector<64x128xbf16>
    %cst_20 = arith.constant dense<0.000000e+00> : vector<64x128xf32>
    %41 = tpu.matmul %0, %40, %cst_20 {dimension_numbers = #tpu.dot_dimension_numbers<[1], [0], [0], [1], [0, 0, 1, 1], [], []>} : vector<64x64xbf16>, vector<64x128xbf16>, vector<64x128xf32> -> vector<64x128xf32>
    %cst_21 = arith.constant dense<0.000000e+00> : vector<128xf32>
    %42 = vector.multi_reduction <add>, %41, %cst_21 [0] : vector<64x128xf32> to vector<128xf32>
    %43 = vector.shape_cast %42 : vector<128xf32> to vector<1x128xf32>
    %cst_22 = arith.constant 1.562500e-02 : f32
    %44 = vector.broadcast %cst_22 : f32 to vector<1x128xf32>
    %45 = arith.mulf %43, %44 : vector<1x128xf32>
    %46 = vector.broadcast %45 : vector<1x128xf32> to vector<64x128xf32>
    %47 = arith.subf %41, %46 : vector<64x128xf32>
    %48 = arith.mulf %47, %47 : vector<64x128xf32>
    %cst_23 = arith.constant dense<0.000000e+00> : vector<128xf32>
    %49 = vector.multi_reduction <add>, %48, %cst_23 [0] : vector<64x128xf32> to vector<128xf32>
    %50 = vector.shape_cast %49 : vector<128xf32> to vector<1x128xf32>
    %cst_24 = arith.constant 1.562500e-02 : f32
    %51 = vector.broadcast %cst_24 : f32 to vector<1x128xf32>
    %52 = arith.mulf %50, %51 : vector<1x128xf32>
    %c1_25 = arith.constant 1 : index
    %c0_26 = arith.constant 0 : index
    %c0_27 = arith.constant 0 : index
    %53 = vector.load %arg4[%c1_25, %c0_26, %c0_27] : memref<2x8x128xf32, #tpu.memory_space<vmem>>, vector<1x8x128xf32>
    %54 = vector.shape_cast %53 : vector<1x8x128xf32> to vector<8x128xf32>
    %55 = vector.extract_strided_slice %54 {offsets = [0, 0], sizes = [1, 128], strides = [1, 1]} : vector<8x128xf32> to vector<1x128xf32>
    %cst_28 = arith.constant 9.99999974E-6 : f32
    %56 = vector.broadcast %cst_28 : f32 to vector<1x128xf32>
    %57 = arith.addf %52, %56 : vector<1x128xf32>
    %58 = math.rsqrt %57 : vector<1x128xf32>
    %59 = arith.mulf %55, %58 : vector<1x128xf32>
    %60 = vector.broadcast %59 : vector<1x128xf32> to vector<64x128xf32>
    %61 = arith.mulf %47, %60 : vector<64x128xf32>
    %62 = vector.extract_strided_slice %54 {offsets = [1, 0], sizes = [1, 128], strides = [1, 1]} : vector<8x128xf32> to vector<1x128xf32>
    %63 = vector.broadcast %62 : vector<1x128xf32> to vector<64x128xf32>
    %64 = arith.addf %61, %63 : vector<64x128xf32>
    %c1_29 = arith.constant 1 : index
    %65 = memref.load %arg5[%c1_29] : memref<2xf32, #tpu.memory_space<smem>>
    %cst_30 = arith.constant 0.000000e+00 : f32
    %66 = vector.broadcast %cst_30 : f32 to vector<64x128xf32>
    %67 = arith.cmpf ogt, %64, %66 : vector<64x128xf32>
    %68 = vector.broadcast %65 : f32 to vector<64x128xf32>
    %69 = arith.mulf %68, %64 : vector<64x128xf32>
    %70 = arith.select %67, %64, %69 : vector<64x128xi1>, vector<64x128xf32>
    %c0_31 = arith.constant 0 : index
    %c0_32 = arith.constant 0 : index
    %71 = vector.load %arg6[%c0_31, %c0_32] : memref<64x128xf32, #tpu.memory_space<vmem>>, vector<64x128xf32>
    tpu.vector_store %arg6[%c0_31, %c0_32], %70 {strides = array<i32>} : memref<64x128xf32, #tpu.memory_space<vmem>>, vector<64x128xf32>,
    return
  }
  func.func @transform_0(%arg0: i32) -> (i32, i32) {
    %c0_i32 = arith.constant 0 : i32
    %c0_i32_0 = arith.constant 0 : i32
    %c0_i32_1 = arith.constant 0 : i32
    return %c0_i32, %c0_i32_0 : i32, i32
  }
  func.func @transform_1(%arg0: i32) -> (i32, i32) {
    %c0_i32 = arith.constant 0 : i32
    %c0_i32_0 = arith.constant 0 : i32
    %c0_i32_1 = arith.constant 0 : i32
    return %c0_i32, %c0_i32_0 : i32, i32
  }
  func.func @transform_2(%arg0: i32) -> (i32, i32, i32) {
    %c0_i32 = arith.constant 0 : i32
    %c0_i32_0 = arith.constant 0 : i32
    %c0_i32_1 = arith.constant 0 : i32
    %c0_i32_2 = arith.constant 0 : i32
    return %c0_i32, %c0_i32_0, %c0_i32_1 : i32, i32, i32
  }
  func.func @transform_3(%arg0: i32) -> (i32, i32, i32) {
    %c0_i32 = arith.constant 0 : i32
    %c0_i32_0 = arith.constant 0 : i32
    %c0_i32_1 = arith.constant 0 : i32
    %c0_i32_2 = arith.constant 0 : i32
    return %c0_i32, %c0_i32_0, %c0_i32_1 : i32, i32, i32
  }
  func.func @transform_4(%arg0: i32) -> i32 {
    %c0_i32 = arith.constant 0 : i32
    %c0_i32_0 = arith.constant 0 : i32
    return %c0_i32 : i32
  }
  func.func @transform_5(%arg0: i32) -> (i32, i32) {
    %c0_i32 = arith.constant 0 : i32
    %c0_i32_0 = arith.constant 0 : i32
    %c0_i32_1 = arith.constant 0 : i32
    return %c0_i32, %c0_i32_0 : i32, i32
  }
}

</mosaic_0001>

<bundles_post_ra>
// kernel: _gcn_forward_padded.1
= control target key start
LH: loop header
LB: loop body
LE: loop exit
PB: predicated region body
PF: predicated region fallthrough
CT: control target
= control target key end

     0   :  { %10 = vsyncpa [#allocation3], 0  ;;  %s1279_s0 = inlined_call_operand.hbm [shape: bf16[64,64], index: 0, kind: input, shape index: {}]   ;;  %s1280_s1 = inlined_call_operand.hbm [shape: bf16[64,128], index: 1, kind: input, shape index: {}]   ;;  %s1281_s2 = inlined_call_operand.hbm [shape: bf16[2,128,128], index: 2, kind: input, shape index: {}]   ;;  %s1282_s3 = inlined_call_operand.hbm [shape: f32[2,8,128], index: 3, kind: input, shape index: {}]   ;;  %s1283_s4 = inlined_call_operand.vmem [shape: f32[2], index: 4, kind: input, shape index: {}]   ;;  %s1284_s5 = inlined_call_operand.hbm [shape: f32[64,128], index: 5, kind: output, shape index: {}]  }
   0x1   :  { %11 = vsyncpa [#allocation7], 0 }
   0x2   :  { %12 = vsyncpa [#allocation10], 0 }
   0x3   :  { %13 = vsyncpa [#allocation5], 0 }
   0x4   :  { %14 = vsyncpa [#allocation4], 0  ;;  %s1112_s18 = smov [#allocation6]   ;;  %s1113_s20 = smov [#allocation2]  }
   0x5   :  { %s32_s19 = sshll.u32 %s1112_s18, 4  ;;  %s20_s21 = sshll.u32 %s1113_s20, 4  ;;  %s33_s19 = int_to_ptr.vmem [resolvable:$true] %s32_s19  ;;  %s1152_s21 = int_to_ptr.vmem [resolvable:$true] %s20_s21 }
   0x6   :  { %s980_s24 = scalar_lea.hbm %s1280_s1, 512 }
   0x7   :  { %p981_p0 = scmp.ne.s32.totalorder %s1280_s1, %s980_s24  ;;  %p984_p1 = scmp.lt.u32.totalorder %s980_s24, %s1280_s1 }
   0x9   :  { %p986_p2 = pnand %p984_p1, %p981_p0 }
   0xb   :  { %989 = shalt.err (!%p986_p2)
}
   0xc   :  { %s990_s29 = scalar_lea.vmem %s33_s19, 512  ;;  %p995_p4 = scmp.lt.s32.totalorder %s33_s19, %s33_s19 }
   0xd   :  { %p991_p3 = scmp.ne.s32.totalorder %s33_s19, %s990_s29  ;;  %p996_p5 = scmp.lt.s32.totalorder %s990_s29, %s990_s29 }
   0xf   :  { %p997_p6 = por %p996_p5, %p995_p4 }
  0x11   :  { %p998_p7 = pnand %p997_p6, %p991_p3 }
  0x13   :  { %1001 = shalt.err (!%p998_p7)
}
  0x14   :  { %s1114_s30 = smov 64   ;;  %s1115_s6 = smov 4  }
  0x15   :  { %38 = dma.hbm_to_vmem [thread:$0]  %s1280_s1, 512, %s33_s19, [#allocation7], %s1114_s30, %s1114_s30, %s1115_s6  }
  0x16   :  { %s1002_s11 = scalar_lea.hbm %s1279_s0, 512 }
  0x17   :  { %p1003_p8 = scmp.ne.s32.totalorder %s1279_s0, %s1002_s11  ;;  %p1006_p9 = scmp.lt.u32.totalorder %s1002_s11, %s1279_s0 }
  0x19   :  { %p1008_p10 = pnand %p1006_p9, %p1003_p8 }
  0x1b   :  { %1011 = shalt.err (!%p1008_p10)
}
  0x1c   :  { %s1012_s16 = scalar_lea.vmem %s1152_s21, 512  ;;  %p1017_p12 = scmp.lt.s32.totalorder %s1152_s21, %s1152_s21 }
  0x1d   :  { %p1013_p11 = scmp.ne.s32.totalorder %s1152_s21, %s1012_s16  ;;  %p1018_p13 = scmp.lt.s32.totalorder %s1012_s16, %s1012_s16 }
  0x1f   :  { %p1019_p0 = por %p1018_p13, %p1017_p12 }
  0x21   :  { %p1020_p1 = pnand %p1019_p0, %p1013_p11 }
  0x23   :  { %1023 = shalt.err (!%p1020_p1)
}
  0x24   :  { %26 = dma.hbm_to_vmem [thread:$0]  %s1279_s0, 512, %s1152_s21, [#allocation3], %s1114_s30, %s1114_s30, %s1115_s6  }
  0x25   :  { %s1116_s18 = smov [#allocation8]   ;;  %s1117_s20 = smov [#allocation9]  }
  0x26   :  { %s44_s19 = sshll.u32 %s1116_s18, 4  ;;  %s56_s22 = sshll.u32 %s1117_s20, 4  ;;  %s45_s19 = int_to_ptr.vmem [resolvable:$true] %s44_s19  ;;  %s1189_s22 = int_to_ptr.vmem [resolvable:$true] %s56_s22 }
  0x27   :  { %s1024_s25 = scalar_lea.hbm %s1281_s2, 2048 }
  0x28   :  { %p1025_p2 = scmp.ne.s32.totalorder %s1281_s2, %s1024_s25  ;;  %p1028_p3 = scmp.lt.u32.totalorder %s1024_s25, %s1281_s2 }
  0x2a   :  { %p1030_p4 = pnand %p1028_p3, %p1025_p2 }
  0x2c   :  { %1033 = shalt.err (!%p1030_p4)
}
  0x2d   :  { %s1034_s0 = scalar_lea.vmem %s45_s19, 2048  ;;  %p1039_p6 = scmp.lt.s32.totalorder %s45_s19, %s45_s19 }
  0x2e   :  { %p1035_p5 = scmp.ne.s32.totalorder %s45_s19, %s1034_s0  ;;  %p1040_p7 = scmp.lt.s32.totalorder %s1034_s0, %s1034_s0 }
  0x30   :  { %p1041_p8 = por %p1040_p7, %p1039_p6 }
  0x32   :  { %p1042_p9 = pnand %p1041_p8, %p1035_p5 }
  0x34   :  { %1045 = shalt.err (!%p1042_p9)
}
  0x35   :  { %50 = dma.hbm_to_vmem [thread:$0]  %s1281_s2, 2048, %s45_s19, [#allocation7], %s1114_s30, %s1114_s30, %s1115_s6  }
  0x36   :  { %s1046_s10 = scalar_lea.hbm %s1282_s3, 256 }
  0x37   :  { %p1047_p10 = scmp.ne.s32.totalorder %s1282_s3, %s1046_s10  ;;  %p1050_p11 = scmp.lt.u32.totalorder %s1046_s10, %s1282_s3 }
  0x39   :  { %p1052_p12 = pnand %p1050_p11, %p1047_p10 }
  0x3b   :  { %1055 = shalt.err (!%p1052_p12)
}
  0x3c   :  { %s1056_s15 = scalar_lea.vmem %s1189_s22, 256  ;;  %p1061_p0 = scmp.lt.s32.totalorder %s1189_s22, %s1189_s22 }
  0x3d   :  { %p1057_p13 = scmp.ne.s32.totalorder %s1189_s22, %s1056_s15  ;;  %p1062_p1 = scmp.lt.s32.totalorder %s1056_s15, %s1056_s15 }
  0x3f   :  { %p1063_p2 = por %p1062_p1, %p1061_p0 }
  0x41   :  { %p1064_p3 = pnand %p1063_p2, %p1057_p13 }
  0x43   :  { %1067 = shalt.err (!%p1064_p3)
}
  0x44   :  { %s1118_s2 = smov 128   ;;  %s1119_s30 = smov 8  }
  0x45   :  { %62 = dma.hbm_to_vmem [thread:$0]  %s1282_s3, 256, %s1189_s22, [#allocation10], %s1118_s2, %s1118_s2, %s1119_s30  }
  0x46   :  { %s69_s18 = sshll.u32 %s1283_s4, 4  ;;  %s70_s18 = int_to_ptr.vmem [resolvable:$true] %s69_s18 }
  0x47   :  { %s1068_s19 = scalar_lea.vmem %s70_s18, 16  ;;  %p1073_p5 = scmp.lt.s32.totalorder %s70_s18, %s70_s18 }
  0x48   :  { %p1069_p4 = scmp.ne.s32.totalorder %s70_s18, %s1068_s19  ;;  %p1074_p6 = scmp.lt.s32.totalorder %s1068_s19, %s1068_s19 }
  0x4a   :  { %p1075_p7 = por %p1074_p6, %p1073_p5 }
  0x4c   :  { %p1076_p8 = pnand %p1075_p7, %p1069_p4 }
  0x4e   :  { %1079 = shalt.err (!%p1076_p8)
}
  0x4f   :  { %s1120_s20 = smov [#allocation11]  }
  0x50   :  { %72 = dma.vmem_to_smem %s70_s18, 16, %s1120_s20, [#allocation5]  }
  0x51   :  { %1102 = dma.done.wait [#allocation3], 512  }
  0x52   :  { %1103 = vsyncadd [#allocation3], 4294966784 }
  0x53   :  { %1104 = dma.done.wait [#allocation7], 2560  }
  0x54   :  { %1105 = vsyncadd [#allocation7], 4294964736 }
  0x55   :  { %1106 = dma.done.wait [#allocation10], 256  }
  0x56   :  { %1107 = vsyncadd [#allocation10], 4294967040 }
  0x57   :  { %1108 = dma.done.wait [#allocation5], 16  }
  0x58   :  { %1109 = vsyncadd [#allocation5], 4294967280 }
  0x59   :  { %88 = sfence }
  0x5a   :  { %v952_v0 = vld [vmem:[#allocation8] sm:$0xff]   ;;  %v953_v1 = vld [vmem:[#allocation8 + $0x8] sm:$0xff]   ;;  %v954_v2 = vld [vmem:[#allocation8 + $0x10] sm:$0xff]   ;;  %vm283_vm0 = vcmask 523264   ;;  %s433_s3 = sld [smem:[#allocation11]]  ;;  %s821_s4 = sld [smem:[#allocation11 + $0x1]] }
  0x5b   :  { %862 = vmatprep.subr.bf16.mxu0 %v952_v0  ;;  %v955_v3 = vld [vmem:[#allocation8 + $0x18] sm:$0xff]   ;;  %v960_v4 = vld [vmem:[#allocation6] sm:$0xff]   ;;  %v957_v6 = vld [vmem:[#allocation8 + $0x28] sm:$0xff]   ;;  %s1121_s22 = smov [#allocation12]  }
  0x5c   :  { %863 = vmatpush3.bf16.msra.mxu0 %v952_v0  ;;  %878 = vmatprep.mubr.bf16.mxu0 %v960_v4  ;;  %v956_v5 = vld [vmem:[#allocation8 + $0x20] sm:$0xff]   ;;  %v958_v7 = vld [vmem:[#allocation8 + $0x30] sm:$0xff]   ;;  %v959_v8 = vld [vmem:[#allocation8 + $0x38] sm:$0xff]   ;;  %s774_s23 = sshll.u32 %s1121_s22, 4  ;;  %s775_s23 = int_to_ptr.vmem [resolvable:$true] %s774_s23 }
  0x5d   :  { %864 = vmatprep.subr.bf16.mxu0 %v953_v1  ;;  %v961_v9 = vld [vmem:[#allocation6 + $0x8] sm:$0xff]   ;;  %v962_v10 = vld [vmem:[#allocation6 + $0x10] sm:$0xff]   ;;  %v963_v11 = vld [vmem:[#allocation6 + $0x18] sm:$0xff]   ;;  %s1080_s24 = scalar_lea.vmem %s775_s23, 1024  ;;  %p1085_p10 = scmp.lt.s32.totalorder %s775_s23, %s775_s23 }
  0x5e   :  { %v964_v12 = vld [vmem:[#allocation2] sm:$0xff]   ;;  %v1231_v25 = vld [vmem:[#allocation2 + $0x8] sm:$0xff]   ;;  %v1233_v26 = vld [vmem:[#allocation2 + $0x10] sm:$0xff]   ;;  %p1081_p9 = scmp.ne.s32.totalorder %s775_s23, %s1080_s24  ;;  %p1086_p11 = scmp.lt.s32.totalorder %s1080_s24, %s1080_s24 }
  0x5f   :  { %894 = vmatprep.mubr.msk.bf16.mxu1 %vm283_vm0, %v964_v12  ;;  %v1239_v27 = vld [vmem:[#allocation2 + $0x18] sm:$0xff]   ;;  %v968_v28 = vld [vmem:[#allocation8 + $0x40] sm:$0xff]   ;;  %v969_v29 = vld [vmem:[#allocation8 + $0x48] sm:$0xff]  }
  0x60   :  { %865 = vmatpush3.bf16.msra.mxu0 %v953_v1  ;;  %v970_v30 = vld [vmem:[#allocation8 + $0x50] sm:$0xff]   ;;  %v971_v31 = vld [vmem:[#allocation8 + $0x58] sm:$0xff]   ;;  %v972_v32 = vld [vmem:[#allocation8 + $0x60] sm:$0xff]   ;;  %p1087_p12 = por %p1086_p11, %p1085_p10 }
  0x61   :  { %866 = vmatprep.subr.bf16.mxu0 %v954_v2  ;;  %v973_v33 = vld [vmem:[#allocation8 + $0x68] sm:$0xff]   ;;  %v974_v34 = vld [vmem:[#allocation8 + $0x70] sm:$0xff]   ;;  %v975_v35 = vld [vmem:[#allocation8 + $0x78] sm:$0xff]  }
  0x62   :  { %p1088_p13 = pnand %p1087_p12, %p1081_p9 }
  0x64   :  { %867 = vmatpush3.bf16.msra.mxu0 %v954_v2 }
  0x65   :  { %868 = vmatprep.subr.bf16.mxu0 %v955_v3 }
  0x68   :  { %869 = vmatpush3.bf16.msra.mxu0 %v955_v3 }
  0x69   :  { %870 = vmatprep.subr.bf16.mxu0 %v956_v5 }
  0x6c   :  { %871 = vmatpush3.bf16.msra.mxu0 %v956_v5 }
  0x6d   :  { %872 = vmatprep.subr.bf16.mxu0 %v957_v6 }
  0x70   :  { %873 = vmatpush3.bf16.msra.mxu0 %v957_v6 }
  0x71   :  { %874 = vmatprep.subr.bf16.mxu0 %v958_v7 }
  0x74   :  { %875 = vmatpush3.bf16.msra.mxu0 %v958_v7 }
  0x75   :  { %876 = vmatprep.subr.bf16.mxu0 %v959_v8 }
  0x78   :  { %877 = vmatpush3.bf16.msra.mxu0 %v959_v8 }
  0x7b   :  { %879 = vmatmul.mubr.bf16.vlgmr.msra.gmra.mrb[0].mxu0 %v961_v9 }
  0x7c   :  { %882 = vmatprep.mubr.bf16.mxu0 %v962_v10 }
  0x83   :  { %883 = vmatmul.mubr.bf16.gmra.mrb[4].mxu0 %v963_v11 }
  0x84   :  { %934 = vmatprep.mubr.msk.bf16.mxu0 %vm283_vm0, %v964_v12 }
 0x14e   :  { %v880_v13 = vpop.f32.mrb[0].mxu0 }
 0x14f   :  { %v228_v14 = vpop.f32.mrb[1].mxu0 }
 0x150   :  { %v881_v15 = vpop.f32.mrb[2].mxu0 }
 0x151   :  { %v260_v16 = vpack.c.bf16 %v881_v15, %v880_v13  ;;  %v231_v17 = vpop.f32.mrb[3].mxu0 }
 0x152   :  { %v259_v18 = vpack.c.bf16 %v231_v17, %v228_v14 }
 0x154   :  { %886 = vmatprep.subr.bf16.mxu1 %v259_v18 }
 0x155   :  { %887 = vmatpush3.bf16.msra.mxu1 %v259_v18 }
 0x156   :  { %v884_v19 = vpop.f32.mrb[4].mxu0  ;;  %888 = vmatprep.subr.bf16.mxu1 %v260_v16 }
 0x157   :  { %v244_v20 = vpop.f32.mrb[5].mxu0 }
 0x158   :  { %v885_v21 = vpop.f32.mrb[6].mxu0 }
 0x159   :  { %v262_v22 = vpack.c.bf16 %v885_v21, %v884_v19  ;;  %v247_v23 = vpop.f32.mrb[7].mxu0  ;;  %889 = vmatpush3.bf16.msra.mxu1 %v260_v16 }
 0x15a   :  { %v261_v24 = vpack.c.bf16 %v247_v23, %v244_v20 }
 0x15c   :  { %890 = vmatprep.subr.bf16.mxu1 %v261_v24 }
 0x15d   :  { %891 = vmatpush3.bf16.msra.mxu1 %v261_v24 }
 0x15e   :  { %892 = vmatprep.subr.bf16.mxu1 %v262_v22 }
 0x161   :  { %893 = vmatpush3.bf16.msra.mxu1 %v262_v22 }
 0x162   :  { %902 = vmatprep.subr.bf16.mxu1 %v968_v28 }
 0x164   :  { %895 = vmatmul.mubr.msk.bf16.vlgmr.msra.gmra.mrb[0].mxu1 %vm283_vm0, %v1231_v25 }
 0x165   :  { %898 = vmatprep.mubr.msk.bf16.mxu1 %vm283_vm0, %v1233_v26  ;;  %903 = vmatpush3.bf16.msra.mxu1 %v968_v28  ;;  %v409_v28 = vlaneseq }
 0x166   :  { %904 = vmatprep.subr.bf16.mxu1 %v969_v29 }
 0x169   :  { %905 = vmatpush3.bf16.msra.mxu1 %v969_v29  ;;  %v1243_v29 = vshrl.u32 %v409_v28, 7 }
 0x16a   :  { %906 = vmatprep.subr.bf16.mxu1 %v970_v30 }
 0x16c   :  { %899 = vmatmul.mubr.msk.bf16.gmra.mrb[4].mxu1 %vm283_vm0, %v1239_v27 }
 0x16d   :  { %907 = vmatpush3.bf16.msra.mxu1 %v970_v30  ;;  %v405_v30 = vld [vmem:[#allocation9] sm:$0xff] }
 0x16e   :  { %908 = vmatprep.subr.bf16.mxu1 %v971_v31 }
 0x171   :  { %909 = vmatpush3.bf16.msra.mxu1 %v971_v31  ;;  %v411_v31 = vsub.s32 0, %v1243_v29 }
 0x172   :  { %910 = vmatprep.subr.bf16.mxu1 %v972_v32 }
 0x175   :  { %911 = vmatpush3.bf16.msra.mxu1 %v972_v32  ;;  %v423_v32 = vsub.s32 1, %v1243_v29 }
 0x176   :  { %912 = vmatprep.subr.bf16.mxu1 %v973_v33 }
 0x179   :  { %913 = vmatpush3.bf16.msra.mxu1 %v973_v33 }
 0x17a   :  { %914 = vmatprep.subr.bf16.mxu1 %v974_v34 }
 0x17d   :  { %915 = vmatpush3.bf16.msra.mxu1 %v974_v34 }
 0x17e   :  { %916 = vmatprep.subr.bf16.mxu1 %v975_v35 }
 0x181   :  { %917 = vmatpush3.bf16.msra.mxu1 %v975_v35 }
 0x237   :  { %v896_v36 = vpop.f32.mrb[0].mxu1 }
 0x238   :  { %v330_v37 = vpop.f32.mrb[1].mxu1 }
 0x239   :  { %v897_v38 = vpop.f32.mrb[2].mxu1 }
 0x23a   :  { %v333_v39 = vpop.f32.mrb[3].mxu1 }
 0x23b   :  { %v361_v40 = vadd.f32 %v333_v39, %v330_v37 }
 0x23d   :  { %v362_v41 = vadd.f32 %v896_v36, %v361_v40 }
 0x23f   :  { %v900_v42 = vpop.f32.mrb[4].mxu1  ;;  %v363_v43 = vadd.f32 %v897_v38, %v362_v41 }
 0x240   :  { %v346_v44 = vpop.f32.mrb[5].mxu1 }
 0x241   :  { %v364_v45 = vadd.f32 %v363_v43, %v346_v44  ;;  %v901_v46 = vpop.f32.mrb[6].mxu1 }
 0x242   :  { %v349_v47 = vpop.f32.mrb[7].mxu1 }
 0x243   :  { %v365_v48 = vadd.f32 %v364_v45, %v349_v47 }
 0x245   :  { %v366_v49 = vadd.f32 %v900_v42, %v365_v48 }
 0x247   :  { %v367_v50 = vadd.f32 %v901_v46, %v366_v49 }
 0x249   :  { %v368_v51 = vrot.slane %v367_v50, 4 }
 0x24b   :  { %v369_v52 = vadd.f32 %v368_v51, %v367_v50 }
 0x24d   :  { %v370_v53 = vrot.slane %v369_v52, 2 }
 0x24f   :  { %v371_v54 = vadd.f32 %v370_v53, %v369_v52 }
 0x251   :  { %v372_v55 = vrot.slane %v371_v54, 1 }
 0x253   :  { %v373_v56 = vadd.f32 %v372_v55, %v371_v54 }
 0x255   :  { %v374_v57 = vmul.f32 0.015625, %v373_v56 }
 0x257   :  { %v375_v58 = vsub.f32 %v330_v37, %v374_v57  ;;  %v376_v59 = vsub.f32 %v333_v39, %v374_v57  ;;  %v377_v60 = vsub.f32 %v896_v36, %v374_v57  ;;  %v378_v61 = vsub.f32 %v897_v38, %v374_v57 }
 0x258   :  { %v379_v62 = vsub.f32 %v346_v44, %v374_v57  ;;  %v380_v63 = vsub.f32 %v349_v47, %v374_v57  ;;  %v381_v0 = vsub.f32 %v900_v42, %v374_v57  ;;  %v382_v1 = vsub.f32 %v901_v46, %v374_v57 }
 0x259   :  { %v383_v2 = vmul.f32 %v375_v58, %v375_v58  ;;  %v384_v3 = vmul.f32 %v376_v59, %v376_v59  ;;  %v385_v4 = vmul.f32 %v377_v60, %v377_v60  ;;  %v386_v6 = vmul.f32 %v378_v61, %v378_v61 }
 0x25a   :  { %v387_v8 = vmul.f32 %v379_v62, %v379_v62  ;;  %v388_v10 = vmul.f32 %v380_v63, %v380_v63  ;;  %v389_v12 = vmul.f32 %v381_v0, %v381_v0  ;;  %v390_v14 = vmul.f32 %v382_v1, %v382_v1 }
 0x25b   :  { %v391_v5 = vadd.f32 %v384_v3, %v383_v2  ;;  %v424_v36 = vrot.slane %v405_v30, %v423_v32  ;;  %v442_v37 = vstv %s433_s3 }
 0x25d   :  { %v392_v7 = vadd.f32 %v391_v5, %v385_v4 }
 0x25f   :  { %v393_v9 = vadd.f32 %v392_v7, %v386_v6 }
 0x261   :  { %v394_v11 = vadd.f32 %v393_v9, %v387_v8 }
 0x263   :  { %v395_v13 = vadd.f32 %v394_v11, %v388_v10 }
 0x265   :  { %v396_v15 = vadd.f32 %v395_v13, %v389_v12 }
 0x267   :  { %v397_v16 = vadd.f32 %v396_v15, %v390_v14 }
 0x269   :  { %v398_v17 = vrot.slane %v397_v16, 4 }
 0x26b   :  { %v399_v18 = vadd.f32 %v398_v17, %v397_v16 }
 0x26d   :  { %v400_v19 = vrot.slane %v399_v18, 2 }
 0x26f   :  { %v401_v20 = vadd.f32 %v400_v19, %v399_v18 }
 0x271   :  { %v402_v21 = vrot.slane %v401_v20, 1 }
 0x273   :  { %v403_v22 = vadd.f32 %v402_v21, %v401_v20 }
 0x275   :  { %v404_v23 = vmul.f32 0.015625, %v403_v22 }
 0x277   :  { %v406_v24 = vadd.f32 1e-05, %v404_v23 }
 0x279   :  { %976 = vrsqrt.f32 %v406_v24 }
 0x283   :  { %v977_v33 = vpop.eup %976 }
 0x284   :  { %v408_v34 = vmul.f32 %v977_v33, %v405_v30 }
 0x286   :  { %v412_v35 = vrot.slane %v408_v34, %v411_v31 }
 0x288   :  { %v415_v38 = vmul.f32 %v412_v35, %v377_v60  ;;  %v416_v39 = vmul.f32 %v412_v35, %v378_v61  ;;  %v418_v40 = vmul.f32 %v412_v35, %v380_v63  ;;  %v413_v41 = vmul.f32 %v412_v35, %v375_v58 }
 0x289   :  { %v414_v42 = vmul.f32 %v412_v35, %v376_v59  ;;  %v417_v43 = vmul.f32 %v412_v35, %v379_v62  ;;  %v419_v44 = vmul.f32 %v412_v35, %v381_v0  ;;  %v420_v45 = vmul.f32 %v412_v35, %v382_v1 }
 0x28a   :  { %v430_v46 = vadd.f32 %v424_v36, %v418_v40  ;;  %v425_v47 = vadd.f32 %v424_v36, %v413_v41  ;;  %v427_v48 = vadd.f32 %v424_v36, %v415_v38  ;;  %v428_v49 = vadd.f32 %v424_v36, %v416_v39 }
 0x28b   :  { %v426_v50 = vadd.f32 %v424_v36, %v414_v42  ;;  %v429_v51 = vadd.f32 %v424_v36, %v417_v43  ;;  %v431_v52 = vadd.f32 %v424_v36, %v419_v44  ;;  %v432_v53 = vadd.f32 %v424_v36, %v420_v45 }
 0x28c   :  { %vm434_vm1 = vcmp.gt.f32.partialorder %v425_v47, 0.0  ;;  %v443_v54 = vmul.f32 %v442_v37, %v425_v47  ;;  %vm436_vm2 = vcmp.gt.f32.partialorder %v427_v48, 0.0  ;;  %vm437_vm3 = vcmp.gt.f32.partialorder %v428_v49, 0.0 }
 0x28d   :  { %vm435_vm4 = vcmp.gt.f32.partialorder %v426_v50, 0.0  ;;  %v444_v55 = vmul.f32 %v442_v37, %v426_v50  ;;  %v445_v56 = vmul.f32 %v442_v37, %v427_v48  ;;  %v446_v57 = vmul.f32 %v442_v37, %v428_v49 }
 0x28e   :  { %v451_v58 = vsel %vm434_vm1, %v425_v47, %v443_v54  ;;  %vm438_vm5 = vcmp.gt.f32.partialorder %v429_v51, 0.0  ;;  %vm439_vm6 = vcmp.gt.f32.partialorder %v430_v46, 0.0  ;;  %v447_v59 = vmul.f32 %v442_v37, %v429_v51 }
 0x28f   :  { %v452_v60 = vsel %vm435_vm4, %v426_v50, %v444_v55  ;;  %v453_v61 = vsel %vm436_vm2, %v427_v48, %v445_v56  ;;  %v454_v62 = vsel %vm437_vm3, %v428_v49, %v446_v57  ;;  %v448_v63 = vmul.f32 %v442_v37, %v430_v46 }
 0x290   :  { %v459_v0 = vpack.c.bf16 %v452_v60, %v451_v58  ;;  %v460_v1 = vpack.c.bf16 %v454_v62, %v453_v61  ;;  %v455_v2 = vsel %vm438_vm5, %v429_v51, %v447_v59  ;;  %vm440_vm7 = vcmp.gt.f32.partialorder %v431_v52, 0.0 }
 0x291   :  { %v456_v3 = vsel %vm439_vm6, %v430_v46, %v448_v63  ;;  %vm441_vm8 = vcmp.gt.f32.partialorder %v432_v53, 0.0  ;;  %v449_v4 = vmul.f32 %v442_v37, %v431_v52  ;;  %v450_v5 = vmul.f32 %v442_v37, %v432_v53 }
 0x292   :  { %918 = vmatprep.mubr.bf16.mxu1 %v459_v0  ;;  %v461_v6 = vpack.c.bf16 %v456_v3, %v455_v2 }
 0x293   :  { %919 = vmatmul.mubr.bf16.vlgmr.msra.gmra.mrb[8].mxu1 %v460_v1  ;;  %v457_v7 = vsel %vm440_vm7, %v431_v52, %v449_v4  ;;  %v458_v8 = vsel %vm441_vm8, %v432_v53, %v450_v5 }
 0x294   :  { %922 = vmatprep.mubr.bf16.mxu1 %v461_v6  ;;  %v462_v9 = vpack.c.bf16 %v458_v8, %v457_v7 }
 0x29b   :  { %923 = vmatmul.mubr.bf16.gmra.mrb[12].mxu1 %v462_v9 }
 0x366   :  { %v920_v10 = vpop.f32.mrb[8].mxu1 }
 0x367   :  { %v562_v11 = vpop.f32.mrb[9].mxu1 }
 0x368   :  { %v921_v12 = vpop.f32.mrb[10].mxu1 }
 0x369   :  { %v594_v13 = vpack.c.bf16 %v921_v12, %v920_v10  ;;  %v565_v14 = vpop.f32.mrb[11].mxu1 }
 0x36a   :  { %v593_v15 = vpack.c.bf16 %v565_v14, %v562_v11  ;;  %v707_v14 = vld [vmem:[#allocation9 + $0x8] sm:$0xff] }
 0x36c   :  { %926 = vmatprep.subr.bf16.mxu0 %v593_v15 }
 0x36d   :  { %927 = vmatpush3.bf16.msra.mxu0 %v593_v15 }
 0x36e   :  { %v924_v16 = vpop.f32.mrb[12].mxu1  ;;  %928 = vmatprep.subr.bf16.mxu0 %v594_v13 }
 0x36f   :  { %v578_v17 = vpop.f32.mrb[13].mxu1 }
 0x370   :  { %v925_v18 = vpop.f32.mrb[14].mxu1 }
 0x371   :  { %v596_v19 = vpack.c.bf16 %v925_v18, %v924_v16  ;;  %v581_v20 = vpop.f32.mrb[15].mxu1  ;;  %929 = vmatpush3.bf16.msra.mxu0 %v594_v13  ;;  %v726_v18 = vrot.slane %v707_v14, %v423_v32 }
 0x372   :  { %v595_v21 = vpack.c.bf16 %v581_v20, %v578_v17 }
 0x374   :  { %930 = vmatprep.subr.bf16.mxu0 %v595_v21 }
 0x375   :  { %931 = vmatpush3.bf16.msra.mxu0 %v595_v21 }
 0x376   :  { %932 = vmatprep.subr.bf16.mxu0 %v596_v19 }
 0x379   :  { %933 = vmatpush3.bf16.msra.mxu0 %v596_v19  ;;  %v744_v19 = vstv %s821_s4 }
 0x37c   :  { %935 = vmatmul.mubr.msk.bf16.vlgmr.msra.gmra.mrb[8].mxu0 %vm283_vm0, %v1231_v25 }
 0x37d   :  { %938 = vmatprep.mubr.msk.bf16.mxu0 %vm283_vm0, %v1233_v26 }
 0x384   :  { %939 = vmatmul.mubr.msk.bf16.gmra.mrb[12].mxu0 %vm283_vm0, %v1239_v27 }
 0x44f   :  { %v936_v22 = vpop.f32.mrb[8].mxu0 }
 0x450   :  { %v631_v23 = vpop.f32.mrb[9].mxu0 }
 0x451   :  { %v937_v24 = vpop.f32.mrb[10].mxu0 }
 0x452   :  { %v634_v28 = vpop.f32.mrb[11].mxu0 }
 0x453   :  { %v662_v30 = vadd.f32 %v634_v28, %v631_v23 }
 0x455   :  { %v663_v33 = vadd.f32 %v936_v22, %v662_v30 }
 0x457   :  { %v940_v34 = vpop.f32.mrb[12].mxu0  ;;  %v664_v35 = vadd.f32 %v937_v24, %v663_v33 }
 0x458   :  { %v647_v36 = vpop.f32.mrb[13].mxu0 }
 0x459   :  { %v665_v37 = vadd.f32 %v664_v35, %v647_v36  ;;  %v941_v38 = vpop.f32.mrb[14].mxu0 }
 0x45a   :  { %v650_v39 = vpop.f32.mrb[15].mxu0 }
 0x45b   :  { %v666_v40 = vadd.f32 %v665_v37, %v650_v39 }
 0x45d   :  { %v667_v25 = vadd.f32 %v940_v34, %v666_v40 }
 0x45f   :  { %v668_v41 = vadd.f32 %v941_v38, %v667_v25 }
 0x461   :  { %v669_v42 = vrot.slane %v668_v41, 4 }
 0x463   :  { %v670_v26 = vadd.f32 %v669_v42, %v668_v41 }
 0x465   :  { %v671_v43 = vrot.slane %v670_v26, 2 }
 0x467   :  { %v672_v44 = vadd.f32 %v671_v43, %v670_v26 }
 0x469   :  { %v673_v27 = vrot.slane %v672_v44, 1 }
 0x46b   :  { %v674_v45 = vadd.f32 %v673_v27, %v672_v44 }
 0x46d   :  { %v675_v46 = vmul.f32 0.015625, %v674_v45 }
 0x46f   :  { %v676_v47 = vsub.f32 %v631_v23, %v675_v46  ;;  %v677_v48 = vsub.f32 %v634_v28, %v675_v46  ;;  %v678_v49 = vsub.f32 %v936_v22, %v675_v46  ;;  %v679_v50 = vsub.f32 %v937_v24, %v675_v46 }
 0x470   :  { %v680_v51 = vsub.f32 %v647_v36, %v675_v46  ;;  %v681_v52 = vsub.f32 %v650_v39, %v675_v46  ;;  %v682_v53 = vsub.f32 %v940_v34, %v675_v46  ;;  %v683_v54 = vsub.f32 %v941_v38, %v675_v46 }
 0x471   :  { %v684_v55 = vmul.f32 %v676_v47, %v676_v47  ;;  %v685_v56 = vmul.f32 %v677_v48, %v677_v48  ;;  %v686_v57 = vmul.f32 %v678_v49, %v678_v49  ;;  %v687_v59 = vmul.f32 %v679_v50, %v679_v50 }
 0x472   :  { %v688_v61 = vmul.f32 %v680_v51, %v680_v51  ;;  %v689_v63 = vmul.f32 %v681_v52, %v681_v52  ;;  %v690_v1 = vmul.f32 %v682_v53, %v682_v53  ;;  %v691_v3 = vmul.f32 %v683_v54, %v683_v54 }
 0x473   :  { %v692_v58 = vadd.f32 %v685_v56, %v684_v55 }
 0x475   :  { %v693_v60 = vadd.f32 %v692_v58, %v686_v57 }
 0x477   :  { %v694_v62 = vadd.f32 %v693_v60, %v687_v59 }
 0x479   :  { %v695_v0 = vadd.f32 %v694_v62, %v688_v61 }
 0x47b   :  { %v696_v2 = vadd.f32 %v695_v0, %v689_v63 }
 0x47d   :  { %v697_v4 = vadd.f32 %v696_v2, %v690_v1 }
 0x47f   :  { %v698_v5 = vadd.f32 %v697_v4, %v691_v3 }
 0x481   :  { %v699_v6 = vrot.slane %v698_v5, 4 }
 0x483   :  { %v700_v7 = vadd.f32 %v699_v6, %v698_v5 }
 0x485   :  { %v701_v8 = vrot.slane %v700_v7, 2 }
 0x487   :  { %v702_v9 = vadd.f32 %v701_v8, %v700_v7 }
 0x489   :  { %v703_v10 = vrot.slane %v702_v9, 1 }
 0x48b   :  { %v704_v11 = vadd.f32 %v703_v10, %v702_v9 }
 0x48d   :  { %v705_v12 = vmul.f32 0.015625, %v704_v11 }
 0x48f   :  { %v708_v13 = vadd.f32 1e-05, %v705_v12 }
 0x491   :  { %978 = vrsqrt.f32 %v708_v13 }
 0x49b   :  { %v979_v15 = vpop.eup %978 }
 0x49c   :  { %v710_v16 = vmul.f32 %v979_v15, %v707_v14 }
 0x49e   :  { %v714_v17 = vrot.slane %v710_v16, %v411_v31 }
 0x4a0   :  { %v715_v20 = vmul.f32 %v714_v17, %v676_v47  ;;  %v716_v21 = vmul.f32 %v714_v17, %v677_v48  ;;  %v717_v22 = vmul.f32 %v714_v17, %v678_v49  ;;  %v718_v23 = vmul.f32 %v714_v17, %v679_v50 }
 0x4a1   :  { %v719_v24 = vmul.f32 %v714_v17, %v680_v51  ;;  %v720_v28 = vmul.f32 %v714_v17, %v681_v52  ;;  %v721_v30 = vmul.f32 %v714_v17, %v682_v53  ;;  %v722_v33 = vmul.f32 %v714_v17, %v683_v54 }
 0x4a2   :  { %v727_v34 = vadd.f32 %v726_v18, %v715_v20  ;;  %v728_v35 = vadd.f32 %v726_v18, %v716_v21  ;;  %v729_v36 = vadd.f32 %v726_v18, %v717_v22  ;;  %v730_v37 = vadd.f32 %v726_v18, %v718_v23 }
 0x4a3   :  { %v731_v38 = vadd.f32 %v726_v18, %v719_v24  ;;  %v732_v39 = vadd.f32 %v726_v18, %v720_v28  ;;  %v733_v40 = vadd.f32 %v726_v18, %v721_v30  ;;  %v734_v31 = vadd.f32 %v726_v18, %v722_v33 }
 0x4a4   :  { %vm739_vm9 = vcmp.gt.f32.partialorder %v730_v37, 0.0  ;;  %v747_v29 = vmul.f32 %v744_v19, %v729_v36  ;;  %v748_v32 = vmul.f32 %v744_v19, %v730_v37  ;;  %vm736_vm10 = vcmp.gt.f32.partialorder %v727_v34, 0.0 }
 0x4a5   :  { %vm740_vm11 = vcmp.gt.f32.partialorder %v731_v38, 0.0  ;;  %vm741_vm12 = vcmp.gt.f32.partialorder %v732_v39, 0.0  ;;  %vm742_vm13 = vcmp.gt.f32.partialorder %v733_v40, 0.0  ;;  %vm743_vm14 = vcmp.gt.f32.partialorder %v734_v31, 0.0 }
 0x4a6   :  { %v749_v25 = vmul.f32 %v744_v19, %v731_v38  ;;  %v750_v41 = vmul.f32 %v744_v19, %v732_v39  ;;  %v751_v42 = vmul.f32 %v744_v19, %v733_v40  ;;  %v752_v26 = vmul.f32 %v744_v19, %v734_v31 }
 0x4a7   :  { %vm737_vm15 = vcmp.gt.f32.partialorder %v728_v35, 0.0  ;;  %vm738_vm0 = vcmp.gt.f32.partialorder %v729_v36, 0.0  ;;  %v745_v43 = vmul.f32 %v744_v19, %v727_v34  ;;  %v746_v44 = vmul.f32 %v744_v19, %v728_v35 }
 0x4a8   :  { %v757_v27 = vsel %vm740_vm11, %v731_v38, %v749_v25  ;;  %v758_v45 = vsel %vm741_vm12, %v732_v39, %v750_v41  ;;  %v759_v46 = vsel %vm742_vm13, %v733_v40, %v751_v42  ;;  %v755_v47 = vsel %vm738_vm0, %v729_v36, %v747_v29 }
 0x4a9   :  { %765 = vst [vmem:[#allocation12 + $0x20] sm:$0xff] %v757_v27  ;;  %766 = vst [vmem:[#allocation12 + $0x28] sm:$0xff] %v758_v45  ;;  %v753_v48 = vsel %vm736_vm10, %v727_v34, %v745_v43  ;;  %v754_v49 = vsel %vm737_vm15, %v728_v35, %v746_v44  ;;  %v756_v50 = vsel %vm739_vm9, %v730_v37, %v748_v32 }
 0x4aa   :  { %767 = vst [vmem:[#allocation12 + $0x30] sm:$0xff] %v759_v46  ;;  %v760_v51 = vsel %vm743_vm14, %v734_v31, %v752_v26  ;;  %763 = vst [vmem:[#allocation12 + $0x10] sm:$0xff] %v755_v47 }
 0x4ab   :  { %761 = vst [vmem:[#allocation12] sm:$0xff] %v753_v48  ;;  %762 = vst [vmem:[#allocation12 + $0x8] sm:$0xff] %v754_v49 }
 0x4ac   :  { %764 = vst [vmem:[#allocation12 + $0x18] sm:$0xff] %v756_v50  ;;  %768 = vst [vmem:[#allocation12 + $0x38] sm:$0xff] %v760_v51 }
 0x4ad   :  { %1091 = shalt.err (!%p1088_p13)
}
 0x4ae   :  { %s1092_s27 = scalar_lea.hbm %s1284_s5, 1024 }
 0x4af   :  { %p1093_p0 = scmp.ne.s32.totalorder %s1284_s5, %s1092_s27  ;;  %p1096_p1 = scmp.lt.u32.totalorder %s1092_s27, %s1284_s5 }
 0x4b1   :  { %p1098_p2 = pnand %p1096_p1, %p1093_p0 }
 0x4b3   :  { %1101 = shalt.err (!%p1098_p2)
}
 0x4b4   :  { %780 = dma.vmem_to_hbm [thread:$0]  %s775_s23, 1024, %s1284_s5, [#allocation4], %s1118_s2, %s1118_s2, %s1119_s30  }
 0x4b5   :  { %1110 = dma.done.wait [#allocation4], 1024  }
 0x4b6   :  { %1111 = vsyncadd [#allocation4], 4294966272 }
 0x4b7   :  { %784 = vsyncpa [#allocation3], 1 }
 0x4b8   :  { %785 = vsyncpa [#allocation7], 1 }
 0x4b9   :  { %786 = vsyncpa [#allocation10], 1 }
 0x4ba   :  { %787 = vsyncpa [#allocation4], 1 }
 0x4bb   :  { %788 = vsyncpa [#allocation5], 1 }

</bundles_post_ra>
